<compile_context>
chip_gen: v7x
topology: tpu7x:2x2x1
jax: 0.10.0
libtpu: 0.0.40
codegen_flags: <defaults>
</compile_context>

<pallas_src>
import functools

import jax
import jax.numpy as jnp
from jax.experimental import pallas as pl
from jax.experimental.pallas import tpu as pltpu

LANE = 128  # TPU lane width (last-dim tile)


def _round_up(n, m):
    return ((n + m - 1) // m) * m


def mlp_kernel(x_ref, w1_ref, b1_ref, w2_ref, b2_ref, o_ref):
    """Fused 2-layer MLP: relu(x @ W1 + b1) @ W2 + b2.

    x arrives f32 and is cast to bf16 in-kernel (saves a separate XLA convert +
    HBM materialization in the wrapper). Matmuls run bf16 on the MXU with f32
    accumulation; bias-add / ReLU stay f32 on the VPU. Weight lanes are padded
    to 128 so both dots are full lane width and the output store is an
    unmasked lane-dense vst.
    """
    x = x_ref[...].astype(jnp.bfloat16)
    h = jnp.dot(x, w1_ref[...], preferred_element_type=jnp.float32)
    h = jnp.maximum(h + b1_ref[...], 0.0)                      # bias + ReLU, f32
    o = jnp.dot(h.astype(w2_ref.dtype), w2_ref[...],
                preferred_element_type=jnp.float32)
    o_ref[...] = (o + b2_ref[...]).astype(o_ref.dtype)


def prepare_params(w1, b1, w2, b2):
    """One-time weight prep: zero-pad lanes to 128, cast weights to bf16.

    Args (weights already transposed to (in, out) vs. torch's (out, in)):
      w1: (D_in, H), b1: (H,), w2: (H, 10), b2: (10,)
    Returns padded bf16 weights / f32 (1, padded) biases plus the true n_out.

    Zero-padded W1 columns give h_pad = relu(0 + 0) = 0; zero-padded W2
    rows/cols + zero b2 padding keep padded output lanes at exactly 0, so the
    real (B, 10) slice is unchanged math.
    """
    d_in, hidden = w1.shape
    n_out = w2.shape[1]
    d_in_p = _round_up(d_in, LANE)
    hid_p = _round_up(hidden, LANE)
    out_p = _round_up(n_out, LANE)

    w1_p = jnp.pad(w1.astype(jnp.bfloat16),
                   ((0, d_in_p - d_in), (0, hid_p - hidden)))
    b1_p = jnp.pad(b1.astype(jnp.float32), (0, hid_p - hidden)).reshape(1, hid_p)
    w2_p = jnp.pad(w2.astype(jnp.bfloat16),
                   ((0, hid_p - hidden), (0, out_p - n_out)))
    b2_p = jnp.pad(b2.astype(jnp.float32), (0, out_p - n_out)).reshape(1, out_p)
    return w1_p, b1_p, w2_p, b2_p, n_out


@functools.partial(jax.jit, static_argnames=("n_out",))
def adaptive_net_forward(x_nchw, w1_p, b1_p, w2_p, b2_p, *, n_out):
    """Forward pass matching AdaptiveNeuralNet.forward (complexity level 1).

    Args:
      x_nchw: (B, C, H, W) input (PyTorch NCHW convention), float32.
      w1_p, b1_p, w2_p, b2_p: padded params from prepare_params().
      n_out: true number of output classes (static, for the final slice).
    Returns:
      (B, n_out) logits, float32.
    """
    B = x_nchw.shape[0]
    d_in_p, hid_p = w1_p.shape
    out_p = w2_p.shape[1]

    # Glue: nn.Flatten. No cast, no batch padding — kernel handles the cast,
    # hardware layout handles sublane padding.
    x2d = x_nchw.reshape(B, -1)
    d_in = x2d.shape[1]
    if d_in != d_in_p:  # static branch; D_IN=256 is already lane-aligned -> skipped
        x2d = jnp.pad(x2d, ((0, 0), (0, d_in_p - d_in)))

    flops = 2 * B * (d_in_p * hid_p + hid_p * out_p)
    bytes_accessed = (B * d_in_p * 4 + w1_p.size * 2 + b1_p.size * 4
                      + w2_p.size * 2 + b2_p.size * 4 + B * out_p * 4)

    out_padded = pl.pallas_call(
        mlp_kernel,
        out_shape=jax.ShapeDtypeStruct((B, out_p), jnp.float32),
        in_specs=[
            pl.BlockSpec(memory_space=pltpu.MemorySpace.VMEM),  # x (f32)
            pl.BlockSpec(memory_space=pltpu.MemorySpace.VMEM),  # w1 (bf16)
            pl.BlockSpec(memory_space=pltpu.MemorySpace.VMEM),  # b1 (f32)
            pl.BlockSpec(memory_space=pltpu.MemorySpace.VMEM),  # w2 (bf16)
            pl.BlockSpec(memory_space=pltpu.MemorySpace.VMEM),  # b2 (f32)
        ],
        out_specs=pl.BlockSpec(memory_space=pltpu.MemorySpace.VMEM),
        cost_estimate=pl.CostEstimate(flops=flops,
                                      bytes_accessed=bytes_accessed,
                                      transcendentals=0),
    )(x2d, w1_p, b1_p, w2_p, b2_p)
    return out_padded[:, :n_out]


def init_params(key, d_in, hidden, n_out):
    """Deterministic init mimicking torch.nn.Linear (uniform +/- 1/sqrt(fan_in))."""
    k1, k2, k3, k4 = jax.random.split(key, 4)
    lim1 = 1.0 / jnp.sqrt(d_in)
    lim2 = 1.0 / jnp.sqrt(hidden)
    w1 = jax.random.uniform(k1, (d_in, hidden), jnp.float32, -lim1, lim1)
    b1 = jax.random.uniform(k2, (hidden,), jnp.float32, -lim1, lim1)
    w2 = jax.random.uniform(k3, (hidden, n_out), jnp.float32, -lim2, lim2)
    b2 = jax.random.uniform(k4, (n_out,), jnp.float32, -lim2, lim2)
    return w1, b1, w2, b2


if __name__ == "__main__":
    # Small shapes consistent with the module: input_size = C*H*W = 1*16*16 = 256,
    # initial_hidden_size = 64, 10 output classes, batch = 2.
    B, C, H, W = 2, 1, 16, 16
    D_IN = C * H * W
    HIDDEN = 64
    N_OUT = 10

    key = jax.random.PRNGKey(0)
    kx, kp = jax.random.split(key)
    x = jax.random.normal(kx, (B, C, H, W), jnp.float32)
    w1, b1, w2, b2 = init_params(kp, D_IN, HIDDEN, N_OUT)

    # One-time padded/bf16 param prep (hoisted out of the per-call path).
    w1_p, b1_p, w2_p, b2_p, n_out = prepare_params(w1, b1, w2, b2)

    out = adaptive_net_forward(x, w1_p, b1_p, w2_p, b2_p, n_out=n_out)
    out = jax.block_until_ready(out)

    # Pure-JAX f32 reference (bf16 MXU operands -> loosened tolerance).
    x2d = x.reshape(B, -1)
    ref = jnp.maximum(x2d @ w1 + b1, 0.0) @ w2 + b2
    assert out.shape == (B, N_OUT)
    assert jnp.allclose(out, ref, atol=3e-2, rtol=3e-2), "mismatch vs reference"

    print("KERNEL_OK")
</pallas_src>

<mosaic_0001>
module attributes {stable_mosaic.version = 11 : i64} {
  func.func @mlp_kernel(%arg0: memref<2x256xf32, #tpu.memory_space<vmem>>, %arg1: memref<256x128xbf16, #tpu.memory_space<vmem>>, %arg2: memref<1x128xf32, #tpu.memory_space<vmem>>, %arg3: memref<128x128xbf16, #tpu.memory_space<vmem>>, %arg4: memref<1x128xf32, #tpu.memory_space<vmem>>, %arg5: memref<2x128xf32, #tpu.memory_space<vmem>>) attributes {dimension_semantics = [], scalar_prefetch = 0 : i64, scratch_operands = 0 : i64, tpu.core_type = #tpu.core_type<tc>} {
    %c0 = arith.constant 0 : index
    %c0_0 = arith.constant 0 : index
    %0 = vector.load %arg0[%c0, %c0_0] : memref<2x256xf32, #tpu.memory_space<vmem>>, vector<2x256xf32>
    %1 = arith.truncf %0 : vector<2x256xf32> to vector<2x256xbf16>
    %c0_1 = arith.constant 0 : index
    %c0_2 = arith.constant 0 : index
    %2 = vector.load %arg1[%c0_1, %c0_2] : memref<256x128xbf16, #tpu.memory_space<vmem>>, vector<256x128xbf16>
    %cst = arith.constant dense<0.000000e+00> : vector<2x128xf32>
    %3 = tpu.matmul %1, %2, %cst {dimension_numbers = #tpu.dot_dimension_numbers<[1], [0], [0], [1], [0, 0, 1, 1], [], []>} : vector<2x256xbf16>, vector<256x128xbf16>, vector<2x128xf32> -> vector<2x128xf32>
    %c0_3 = arith.constant 0 : index
    %c0_4 = arith.constant 0 : index
    %4 = vector.load %arg2[%c0_3, %c0_4] : memref<1x128xf32, #tpu.memory_space<vmem>>, vector<1x128xf32>
    %5 = vector.broadcast %4 : vector<1x128xf32> to vector<2x128xf32>
    %6 = arith.addf %3, %5 : vector<2x128xf32>
    %cst_5 = arith.constant 0.000000e+00 : f32
    %7 = vector.broadcast %cst_5 : f32 to vector<2x128xf32>
    %8 = arith.maximumf %6, %7 : vector<2x128xf32>
    %9 = arith.truncf %8 : vector<2x128xf32> to vector<2x128xbf16>
    %c0_6 = arith.constant 0 : index
    %c0_7 = arith.constant 0 : index
    %10 = vector.load %arg3[%c0_6, %c0_7] : memref<128x128xbf16, #tpu.memory_space<vmem>>, vector<128x128xbf16>
    %cst_8 = arith.constant dense<0.000000e+00> : vector<2x128xf32>
    %11 = tpu.matmul %9, %10, %cst_8 {dimension_numbers = #tpu.dot_dimension_numbers<[1], [0], [0], [1], [0, 0, 1, 1], [], []>} : vector<2x128xbf16>, vector<128x128xbf16>, vector<2x128xf32> -> vector<2x128xf32>
    %c0_9 = arith.constant 0 : index
    %c0_10 = arith.constant 0 : index
    %12 = vector.load %arg4[%c0_9, %c0_10] : memref<1x128xf32, #tpu.memory_space<vmem>>, vector<1x128xf32>
    %13 = vector.broadcast %12 : vector<1x128xf32> to vector<2x128xf32>
    %14 = arith.addf %11, %13 : vector<2x128xf32>
    %c0_11 = arith.constant 0 : index
    %c0_12 = arith.constant 0 : index
    %15 = vector.load %arg5[%c0_11, %c0_12] : memref<2x128xf32, #tpu.memory_space<vmem>>, vector<2x128xf32>
    tpu.vector_store %arg5[%c0_11, %c0_12], %14 {strides = array<i32>} : memref<2x128xf32, #tpu.memory_space<vmem>>, vector<2x128xf32>,
    return
  }
}

</mosaic_0001>

<bundles_post_ra>
// kernel: adaptive_net_forward.1
= control target key start
LH: loop header
LB: loop body
LE: loop exit
PB: predicated region body
PF: predicated region fallthrough
CT: control target
= control target key end

     0   :  { %10 = vsyncpa [#allocation3], 0  ;;  %s641_s0 = inlined_call_operand.vmem [shape: f32[2,256], index: 0, kind: input, shape index: {}]   ;;  %s642_s1 = inlined_call_operand.hbm [shape: bf16[256,128], index: 1, kind: input, shape index: {}]   ;;  %s643_s2 = inlined_call_operand.vmem [shape: f32[1,128], index: 2, kind: input, shape index: {}]   ;;  %s644_s3 = inlined_call_operand.hbm [shape: bf16[128,128], index: 3, kind: input, shape index: {}]   ;;  %s645_s4 = inlined_call_operand.vmem [shape: f32[1,128], index: 4, kind: input, shape index: {}]   ;;  %s646_s5 = inlined_call_operand.hbm [shape: f32[2,128], index: 5, kind: output, shape index: {}]  }
   0x1   :  { %11 = vsyncpa [#allocation6], 0 }
   0x2   :  { %12 = vsyncpa [#allocation4], 0  ;;  %s550_s18 = smov [#allocation2]   ;;  %s478_s22 = scalar_lea.hbm %s642_s1, 2048 }
   0x3   :  { %s20_s19 = sshll.u32 %s550_s18, 4  ;;  %p479_p0 = scmp.ne.s32.totalorder %s642_s1, %s478_s22  ;;  %s21_s19 = int_to_ptr.vmem [resolvable:$true] %s20_s19 }
   0x4   :  { %p482_p1 = scmp.lt.u32.totalorder %s478_s22, %s642_s1 }
   0x6   :  { %p484_p2 = pnand %p482_p1, %p479_p0 }
   0x8   :  { %487 = shalt.err (!%p484_p2)
}
   0x9   :  { %s488_s27 = scalar_lea.vmem %s21_s19, 2048  ;;  %p493_p4 = scmp.lt.s32.totalorder %s21_s19, %s21_s19 }
   0xa   :  { %p489_p3 = scmp.ne.s32.totalorder %s21_s19, %s488_s27  ;;  %p494_p5 = scmp.lt.s32.totalorder %s488_s27, %s488_s27 }
   0xc   :  { %p495_p6 = por %p494_p5, %p493_p4 }
   0xe   :  { %p496_p7 = pnand %p495_p6, %p489_p3 }
  0x10   :  { %499 = shalt.err (!%p496_p7)
}
  0x11   :  { %s551_s28 = smov 64   ;;  %s552_s29 = smov 4  }
  0x12   :  { %26 = dma.hbm_to_vmem [thread:$0]  %s642_s1, 2048, %s21_s19, [#allocation3], %s551_s28, %s551_s28, %s552_s29  }
  0x13   :  { %s553_s7 = smov [#allocation5]   ;;  %s500_s11 = scalar_lea.hbm %s644_s3, 1024 }
  0x14   :  { %s34_s8 = sshll.u32 %s553_s7, 4  ;;  %p501_p8 = scmp.ne.s32.totalorder %s644_s3, %s500_s11  ;;  %s35_s8 = int_to_ptr.vmem [resolvable:$true] %s34_s8 }
  0x15   :  { %p504_p9 = scmp.lt.u32.totalorder %s500_s11, %s644_s3 }
  0x17   :  { %p506_p10 = pnand %p504_p9, %p501_p8 }
  0x19   :  { %509 = shalt.err (!%p506_p10)
}
  0x1a   :  { %s510_s16 = scalar_lea.vmem %s35_s8, 1024  ;;  %p515_p12 = scmp.lt.s32.totalorder %s35_s8, %s35_s8 }
  0x1b   :  { %p511_p11 = scmp.ne.s32.totalorder %s35_s8, %s510_s16  ;;  %p516_p13 = scmp.lt.s32.totalorder %s510_s16, %s510_s16 }
  0x1d   :  { %p517_p0 = por %p516_p13, %p515_p12 }
  0x1f   :  { %p518_p1 = pnand %p517_p0, %p511_p11 }
  0x21   :  { %521 = shalt.err (!%p518_p1)
}
  0x22   :  { %40 = dma.hbm_to_vmem [thread:$0]  %s644_s3, 1024, %s35_s8, [#allocation6], %s551_s28, %s551_s28, %s552_s29  }
  0x23   :  { %544 = dma.done.wait [#allocation3], 2048  }
  0x24   :  { %545 = vsyncadd [#allocation3], 4294965248 }
  0x25   :  { %546 = dma.done.wait [#allocation6], 1024  }
  0x26   :  { %547 = vsyncadd [#allocation6], 4294966272  ;;  %v554_v0 = vmov 0.0   ;;  %v454_v1 = vld [vmem:[#allocation2 + $0x40] sm:$0xff]   ;;  %v456_v3 = vld [vmem:[#allocation2 + $0x48] sm:$0xff]   ;;  %vm555_vm0 = vmmov 0  }
  0x27   :  { %427 = vmatprep.subr.bf16.mxu1 %v554_v0  ;;  %v455_v2 = vld [vmem:[#allocation2] sm:$0xff]   ;;  %396 = vmatprep.subr.bf16.mxu0 %v454_v1  ;;  %v457_v4 = vld [vmem:[#allocation2 + $0x8] sm:$0xff]   ;;  %v458_v5 = vld [vmem:[#allocation2 + $0x50] sm:$0xff]   ;;  %s556_s22 = smov [#allocation7]  }
  0x28   :  { %397 = vmatpush3.bf16.msra.mxu0 %v455_v2  ;;  %v459_v6 = vld [vmem:[#allocation2 + $0x10] sm:$0xff]   ;;  %v460_v7 = vld [vmem:[#allocation2 + $0x58] sm:$0xff]   ;;  %v462_v9 = vld [vmem:[#allocation2 + $0x60] sm:$0xff]   ;;  %443 = vmatprep.mubr.msk.bf16.mxu1 %vm555_vm0, %v554_v0  ;;  %s359_s23 = sshll.u32 %s556_s22, 4  ;;  %s360_s23 = int_to_ptr.vmem [resolvable:$true] %s359_s23 }
  0x29   :  { %398 = vmatprep.subr.bf16.mxu0 %v456_v3  ;;  %v461_v8 = vld [vmem:[#allocation2 + $0x18] sm:$0xff]   ;;  %v463_v10 = vld [vmem:[#allocation2 + $0x20] sm:$0xff]   ;;  %v464_v11 = vld [vmem:[#allocation2 + $0x68] sm:$0xff]   ;;  %p527_p3 = scmp.lt.s32.totalorder %s360_s23, %s360_s23 }
  0x2a   :  { %v369_v12 = vld.sshfl [vmem:[%s641_s0] sm:$0x33 pattern:$0x76325410]  ;;  %v465_v15 = vld [vmem:[#allocation2 + $0x28] sm:$0xff]   ;;  %v466_v18 = vld [vmem:[#allocation2 + $0x70] sm:$0xff]  }
  0x2b   :  { %v59_v13 = vcombine.high %v369_v12, %v369_v12  ;;  %v470_v14 = vld [vmem:[#allocation5] sm:$0xff]   ;;  %v471_v17 = vld [vmem:[#allocation5 + $0x8] sm:$0xff]   ;;  %v467_v19 = vld [vmem:[#allocation2 + $0x30] sm:$0xff]   ;;  %v62_v24 = vpack.c.bf16 %v369_v12, %v369_v12 }
  0x2c   :  { %399 = vmatpush3.bf16.msra.mxu0 %v457_v4  ;;  %428 = vmatpush3.bf16.msra.mxu1 %v470_v14  ;;  %v472_v20 = vld [vmem:[#allocation5 + $0x10] sm:$0xff]   ;;  %v468_v21 = vld [vmem:[#allocation2 + $0x78] sm:$0xff]   ;;  %v474_v25 = vld [vmem:[#allocation5 + $0x20] sm:$0xff]  }
  0x2d   :  { %400 = vmatprep.subr.bf16.mxu0 %v458_v5  ;;  %v63_v16 = vpack.c.bf16 %v59_v13, %v59_v13  ;;  %429 = vmatprep.subr.bf16.mxu1 %v554_v0  ;;  %v469_v22 = vld [vmem:[#allocation2 + $0x38] sm:$0xff]   ;;  %v475_v26 = vld [vmem:[#allocation5 + $0x28] sm:$0xff]   ;;  %v476_v27 = vld [vmem:[#allocation5 + $0x30] sm:$0xff]  }
  0x2e   :  { %v473_v23 = vld [vmem:[#allocation5 + $0x18] sm:$0xff]   ;;  %v370_v30 = vld [vmem:[%s643_s2] ss:$0 sm:$0xff]  ;;  %s522_s2 = scalar_lea.vmem %s360_s23, 32 }
  0x2f   :  { %231 = vmatprep.mubr.bf16.mxu0 %v63_v16  ;;  %v477_v28 = vld [vmem:[#allocation5 + $0x38] sm:$0xff]   ;;  %v387_v38 = vld [vmem:[%s645_s4] ss:$0 sm:$0xff]  ;;  %p523_p2 = scmp.ne.s32.totalorder %s360_s23, %s522_s2  ;;  %p528_p4 = scmp.lt.s32.totalorder %s522_s2, %s522_s2 }
  0x30   :  { %401 = vmatpush3.bf16.msra.mxu0 %v459_v6  ;;  %430 = vmatpush3.bf16.msra.mxu1 %v471_v17 }
  0x31   :  { %402 = vmatprep.subr.bf16.mxu0 %v460_v7  ;;  %431 = vmatprep.subr.bf16.mxu1 %v554_v0  ;;  %p529_p5 = por %p528_p4, %p527_p3 }
  0x33   :  { %p530_p6 = pnand %p529_p5, %p523_p2 }
  0x34   :  { %403 = vmatpush3.bf16.msra.mxu0 %v461_v8  ;;  %432 = vmatpush3.bf16.msra.mxu1 %v472_v20 }
  0x35   :  { %404 = vmatprep.subr.bf16.mxu0 %v462_v9  ;;  %433 = vmatprep.subr.bf16.mxu1 %v554_v0 }
  0x38   :  { %405 = vmatpush3.bf16.msra.mxu0 %v463_v10  ;;  %434 = vmatpush3.bf16.msra.mxu1 %v473_v23 }
  0x39   :  { %406 = vmatprep.subr.bf16.mxu0 %v464_v11  ;;  %435 = vmatprep.subr.bf16.mxu1 %v554_v0 }
  0x3c   :  { %407 = vmatpush3.bf16.msra.mxu0 %v465_v15  ;;  %436 = vmatpush3.bf16.msra.mxu1 %v474_v25 }
  0x3d   :  { %408 = vmatprep.subr.bf16.mxu0 %v466_v18  ;;  %437 = vmatprep.subr.bf16.mxu1 %v554_v0 }
  0x40   :  { %409 = vmatpush3.bf16.msra.mxu0 %v467_v19  ;;  %438 = vmatpush3.bf16.msra.mxu1 %v475_v26 }
  0x41   :  { %410 = vmatprep.subr.bf16.mxu0 %v468_v21  ;;  %439 = vmatprep.subr.bf16.mxu1 %v554_v0 }
  0x44   :  { %411 = vmatpush3.bf16.msra.mxu0 %v469_v22  ;;  %440 = vmatpush3.bf16.msra.mxu1 %v476_v27 }
  0x45   :  { %441 = vmatprep.subr.bf16.mxu1 %v554_v0 }
  0x47   :  { %232 = vmatmul.mubr.bf16.vlgmr.msra.gmra.mrb[0].mxu0 %v62_v24 }
  0x48   :  { %442 = vmatpush3.bf16.msra.mxu1 %v477_v28 }
 0x11a   :  { %v412_v29 = vpop.f32.mrb[0].mxu0 }
 0x11b   :  { %v413_v31 = vpop.f32.mrb[1].mxu0 }
 0x11c   :  { %v414_v32 = vadd.f32 %v413_v31, %v412_v29  ;;  %v415_v33 = vpop.f32.mrb[2].mxu0 }
 0x11d   :  { %v416_v34 = vpop.f32.mrb[3].mxu0 }
 0x11e   :  { %v234_v35 = vadd.f32 %v414_v32, %v370_v30 }
 0x120   :  { %v239_v36 = vmax.f32 %v234_v35, 0.0 }
 0x122   :  { %v240_v37 = vpack.c.bf16 %v239_v36, %v239_v36 }
 0x124   :  { %444 = vmatmul.mubr.bf16.vlgmr.msra.gmra.mrb[0].mxu1 %v240_v37 }
 0x1f7   :  { %v346_v39 = vpop.f32.mrb[0].mxu1 }
 0x1f8   :  { %v347_v40 = vadd.f32 %v387_v38, %v346_v39  ;;  %v445_v41 = vpop.f32.mrb[1].mxu1 }
 0x1f9   :  { %v349_v42 = vpop.f32.mrb[2].mxu1 }
 0x1fa   :  { %352 = vst [vmem:[#allocation7] sm:$0x3] %v347_v40  ;;  %v446_v43 = vpop.f32.mrb[3].mxu1 }
 0x1fb   :  { %533 = shalt.err (!%p530_p6)
}
 0x1fc   :  { %s534_s4 = scalar_lea.hbm %s646_s5, 32 }
 0x1fd   :  { %p535_p7 = scmp.ne.s32.totalorder %s646_s5, %s534_s4  ;;  %p538_p8 = scmp.lt.u32.totalorder %s534_s4, %s646_s5 }
 0x1ff   :  { %p540_p9 = pnand %p538_p8, %p535_p7 }
 0x201   :  { %543 = shalt.err (!%p540_p9)
}
 0x202   :  { %362 = dma.vmem_to_hbm [thread:$0]  %s360_s23, 32, %s646_s5, [#allocation4]  }
 0x203   :  { %548 = dma.done.wait [#allocation4], 32  }
 0x204   :  { %549 = vsyncadd [#allocation4], 4294967264 }
 0x205   :  { %366 = vsyncpa [#allocation3], 1 }
 0x206   :  { %367 = vsyncpa [#allocation6], 1 }
 0x207   :  { %368 = vsyncpa [#allocation4], 1 }

</bundles_post_ra>
